<compile_context>
chip_gen: v7x
topology: tpu7x:2x2x1
jax: 0.10.0
libtpu: 0.0.40
codegen_flags: <defaults>
</compile_context>

<pallas_src>
import functools

import jax
import jax.numpy as jnp
from jax.experimental import pallas as pl
from jax.experimental.pallas import tpu as pltpu


def _round_up(v, m):
    return (v + m - 1) // m * m


# ----------------------------- Pallas kernels -------------------------------- #

def _proj_kernel(x_ref, w_ref, amat_ref, hh_ref, alpha_ref):
    """Fused per-head linear transform + attention logits.

    x_ref    : [TILE_N, F_in_pad]   bf16 node-feature row tile
    w_ref    : [F_in_pad, H*F_out]  bf16 weight, all heads fused along lanes
    amat_ref : [H*F_out, 2*H]       bf16 block-diagonal attention vectors
                                    (cols 0..H-1 = a_src, cols H..2H-1 = a_dst)
    hh_ref   : [TILE_N, H*F_out]    bf16 transformed features (output)
    alpha_ref: [TILE_N, 2*H]        f32 per-head (alpha_src | alpha_dst) (output)
    """
    hh = jnp.dot(x_ref[...], w_ref[...], preferred_element_type=jnp.float32)
    hh_bf16 = hh.astype(jnp.bfloat16)
    hh_ref[...] = hh_bf16
    alpha_ref[...] = jnp.dot(hh_bf16, amat_ref[...],
                             preferred_element_type=jnp.float32)


def _attn_kernel(adst_ref, asrc_ref, hh_ref, adj_ref, bias_ref, out_ref, *,
                 heads, f_out, concat, apply_relu, negative_slope=0.2):
    """Masked-softmax attention + aggregation for one row tile of targets.

    adst_ref : [TILE_N, H]     f32 alpha_dst for this row tile
    asrc_ref : [H, N_pad]      f32 alpha_src for all source nodes (transposed)
    hh_ref   : [N_pad, H*F]    bf16 transformed source features
    adj_ref  : [TILE_N, N_pad] bf16 adjacency mask rows (1 = edge j -> i)
    bias_ref : [1, OUT]        f32 bias
    out_ref  : [TILE_N, OUT]   f32 output rows
    """
    mask = adj_ref[...] > 0                                    # [T, N] bool
    neg_big = jnp.float32(-1e30)

    acc = None
    for h in range(heads):
        a_dst = adst_ref[:, h:h + 1]                           # [T, 1] f32
        a_src = asrc_ref[h:h + 1, :]                           # [1, N] f32
        e = a_dst + a_src                                      # [T, N]
        e = jnp.where(e > 0, e, negative_slope * e)            # LeakyReLU(0.2)
        e = jnp.where(mask, e, neg_big)                        # single mask step
        m = jnp.max(e, axis=-1, keepdims=True)
        p = jnp.exp(e - m)                                     # masked -> underflow to 0
        denom = jnp.sum(p, axis=-1, keepdims=True)
        attn = (p * pl.reciprocal(denom, approx=True)).astype(jnp.bfloat16)

        hh_h = hh_ref[:, h * f_out:(h + 1) * f_out]            # [N, F] bf16
        agg = jnp.dot(attn, hh_h, preferred_element_type=jnp.float32)  # [T, F] f32

        if concat:
            val = agg + bias_ref[:, h * f_out:(h + 1) * f_out]
            if apply_relu:
                val = jnp.maximum(val, 0.0)
            # write each head's result directly into its lane slice of the output
            out_ref[:, h * f_out:(h + 1) * f_out] = val.astype(out_ref.dtype)
        else:
            acc = agg if acc is None else acc + agg

    if not concat:
        out = acc * (1.0 / heads) + bias_ref[...]
        if apply_relu:
            out = jnp.maximum(out, 0.0)
        out_ref[...] = out.astype(out_ref.dtype)


# ------------------------------ Layer wrapper -------------------------------- #

def gat_layer(x, w, a_mat, bias, adj, *, heads, f_out, concat, apply_relu,
              tile_n=128):
    """One GATConv layer on padded, dense inputs.

    x    : [N_pad, F_in_pad] f32/bf16
    w    : [F_in_pad, H*F_out]
    a_mat: [H*F_out, 2*H] block-diagonal attention vectors
    bias : [1, OUT]
    adj  : [N_pad, N_pad] bf16 mask
    """
    n_pad, f_in = x.shape
    hf = heads * f_out
    out_dim = hf if concat else f_out
    assert n_pad % tile_n == 0
    grid = (n_pad // tile_n,)

    x_b = x.astype(jnp.bfloat16)
    w_b = w.astype(jnp.bfloat16)
    amat_b = a_mat.astype(jnp.bfloat16)
    bias_f = bias.astype(jnp.float32)

    cparams = pltpu.CompilerParams(
        dimension_semantics=("parallel",),
        # NOTE(v7x): budget TILE_N against 64 MiB VMEM; this limit is well
        # below every chip's capacity and far above what these tiles need.
        vmem_limit_bytes=32 * 1024 * 1024,
    )

    # Pass 1: fused projection + per-head attention logits (row tiled).
    hh, alpha = pl.pallas_call(
        _proj_kernel,
        out_shape=(jax.ShapeDtypeStruct((n_pad, hf), jnp.bfloat16),
                   jax.ShapeDtypeStruct((n_pad, 2 * heads), jnp.float32)),
        grid_spec=pltpu.PrefetchScalarGridSpec(
            num_scalar_prefetch=0, grid=grid,
            in_specs=[pl.BlockSpec((tile_n, f_in), lambda i: (i, 0)),
                      pl.BlockSpec((f_in, hf), lambda i: (0, 0)),
                      pl.BlockSpec((hf, 2 * heads), lambda i: (0, 0))],
            out_specs=(pl.BlockSpec((tile_n, hf), lambda i: (i, 0)),
                       pl.BlockSpec((tile_n, 2 * heads), lambda i: (i, 0)))),
        compiler_params=cparams,
    )(x_b, w_b, amat_b)

    alpha_src_t = alpha[:, :heads].T        # [H, N_pad] lane-major along sources
    alpha_dst = alpha[:, heads:]            # [N_pad, H]

    # Pass 2: masked softmax attention + aggregation (row tiled).
    kernel = functools.partial(_attn_kernel, heads=heads, f_out=f_out,
                               concat=concat, apply_relu=apply_relu)
    out = pl.pallas_call(
        kernel,
        out_shape=jax.ShapeDtypeStruct((n_pad, out_dim), jnp.float32),
        grid_spec=pltpu.PrefetchScalarGridSpec(
            num_scalar_prefetch=0, grid=grid,
            in_specs=[pl.BlockSpec((tile_n, heads), lambda i: (i, 0)),
                      pl.BlockSpec((heads, n_pad), lambda i: (0, 0)),
                      pl.BlockSpec((n_pad, hf), lambda i: (0, 0)),
                      pl.BlockSpec((tile_n, n_pad), lambda i: (i, 0)),
                      pl.BlockSpec((1, out_dim), lambda i: (0, 0))],
            out_specs=pl.BlockSpec((tile_n, out_dim), lambda i: (i, 0))),
        compiler_params=cparams,
    )(alpha_dst, alpha_src_t, hh, adj, bias_f)
    return out


# ------------------------------ Model wrapper -------------------------------- #

def build_adj(edge_index, n_pad):
    """Dense adjacency mask: adj[i, j] = 1 iff edge j -> i; self-loops added
    on every (incl. padded) diagonal entry so all softmax rows are well defined."""
    src, dst = edge_index[0], edge_index[1]
    adj = jnp.zeros((n_pad, n_pad), jnp.float32)
    adj = adj.at[dst, src].set(1.0)
    adj = jnp.maximum(adj, jnp.eye(n_pad, dtype=jnp.float32))
    return adj.astype(jnp.bfloat16)


def build_att_matrix(a_src, a_dst):
    """[H, F] attention vectors -> [H*F, 2H] block-diagonal matrix so one MXU
    matmul hh @ amat yields all per-head (alpha_src | alpha_dst)."""
    heads, f_out = a_src.shape
    amat = jnp.zeros((heads * f_out, 2 * heads), jnp.float32)
    for h in range(heads):
        amat = amat.at[h * f_out:(h + 1) * f_out, h].set(a_src[h])
        amat = amat.at[h * f_out:(h + 1) * f_out, heads + h].set(a_dst[h])
    return amat


def init_gat_params(key, in_channels, hidden_channels, out_channels, num_heads):
    ks = jax.random.split(key, 8)
    scale1 = 1.0 / jnp.sqrt(in_channels)
    scale2 = 1.0 / jnp.sqrt(hidden_channels * num_heads)
    return {
        # conv1: GATConv(in, hidden, heads=H, concat=True)
        "w1": jax.random.normal(ks[0], (in_channels, num_heads * hidden_channels),
                                jnp.float32) * scale1,
        "a_src1": jax.random.normal(ks[1], (num_heads, hidden_channels),
                                    jnp.float32) * 0.1,
        "a_dst1": jax.random.normal(ks[2], (num_heads, hidden_channels),
                                    jnp.float32) * 0.1,
        "b1": jnp.zeros((num_heads * hidden_channels,), jnp.float32),
        # conv2: GATConv(hidden*H, out, heads=1, concat=False)
        "w2": jax.random.normal(ks[3], (num_heads * hidden_channels, out_channels),
                                jnp.float32) * scale2,
        "a_src2": jax.random.normal(ks[4], (1, out_channels), jnp.float32) * 0.1,
        "a_dst2": jax.random.normal(ks[5], (1, out_channels), jnp.float32) * 0.1,
        "b2": jnp.zeros((out_channels,), jnp.float32),
    }


def gat_forward(params, x, edge_index, *, hidden_channels, out_channels,
                num_heads, tile_n=128):
    n, f_in = x.shape
    n_pad = _round_up(max(n, tile_n), tile_n)
    f_in_pad = _round_up(f_in, 128)
    out_pad = _round_up(out_channels, 128)
    hf1 = num_heads * hidden_channels
    assert hf1 % 128 == 0, "heads*hidden must be a multiple of 128 (lane-dense)"

    adj = build_adj(edge_index, n_pad)
    x_p = jnp.zeros((n_pad, f_in_pad), jnp.float32).at[:n, :f_in].set(x)

    # ---- layer 1 params (pad F_in to 128) ----
    w1 = jnp.zeros((f_in_pad, hf1), jnp.float32).at[:f_in, :].set(params["w1"])
    amat1 = build_att_matrix(params["a_src1"], params["a_dst1"])
    b1 = params["b1"].reshape(1, hf1)

    # ---- layer 2 params (pad out_channels to 128 for lane-dense stores) ----
    w2 = jnp.zeros((hf1, out_pad), jnp.float32).at[:, :out_channels].set(params["w2"])
    a_src2 = jnp.zeros((1, out_pad), jnp.float32).at[:, :out_channels].set(params["a_src2"])
    a_dst2 = jnp.zeros((1, out_pad), jnp.float32).at[:, :out_channels].set(params["a_dst2"])
    amat2 = build_att_matrix(a_src2, a_dst2)
    b2 = jnp.zeros((1, out_pad), jnp.float32).at[:, :out_channels].set(
        params["b2"].reshape(1, -1))

    # x = F.relu(conv1(x, edge_index))
    h = gat_layer(x_p, w1, amat1, b1, adj, heads=num_heads,
                  f_out=hidden_channels, concat=True, apply_relu=True,
                  tile_n=tile_n)
    # x = conv2(x, edge_index)
    out = gat_layer(h, w2, amat2, b2, adj, heads=1, f_out=out_pad,
                    concat=False, apply_relu=False, tile_n=tile_n)
    return out[:n, :out_channels]


# ---------------------------------- main ------------------------------------ #

if __name__ == "__main__":
    num_nodes = 16
    in_channels = 8
    hidden_channels = 64       # matches spec (hidden_channels = 64)
    num_heads = 4
    out_channels = 4           # labels_tensor.max() + 1 (synthetic)
    num_edges = 40

    key = jax.random.PRNGKey(0)
    k_x, k_src, k_dst, k_params = jax.random.split(key, 4)

    x = jax.random.normal(k_x, (num_nodes, in_channels), jnp.float32)
    edge_index = jnp.stack([
        jax.random.randint(k_src, (num_edges,), 0, num_nodes),
        jax.random.randint(k_dst, (num_edges,), 0, num_nodes),
    ], axis=0)                                                   # [2, E]

    params = init_gat_params(k_params, in_channels, hidden_channels,
                             out_channels, num_heads)

    out = gat_forward(params, x, edge_index,
                      hidden_channels=hidden_channels,
                      out_channels=out_channels,
                      num_heads=num_heads)
    out = jax.block_until_ready(out)
    assert out.shape == (num_nodes, out_channels)
    assert bool(jnp.all(jnp.isfinite(out)))
    print("KERNEL_OK")
</pallas_src>

<mosaic_0001>
module attributes {stable_mosaic.version = 11 : i64} {
  func.func @_proj_kernel(%arg0: i32, %arg1: memref<128x128xbf16, #tpu.memory_space<vmem>>, %arg2: memref<128x256xbf16, #tpu.memory_space<vmem>>, %arg3: memref<256x8xbf16, #tpu.memory_space<vmem>>, %arg4: memref<128x256xbf16, #tpu.memory_space<vmem>>, %arg5: memref<128x8xf32, #tpu.memory_space<vmem>>) attributes {dimension_semantics = [#tpu.dimension_semantics<parallel>], iteration_bounds = array<i64: 1>, scalar_prefetch = 0 : i64, scratch_operands = 0 : i64, tpu.core_type = #tpu.core_type<tc>, window_params = [{transform_indices = @transform_0, window_bounds = array<i64: 128, 128>}, {pipeline_mode = #tpu.pipeline_mode<synchronous>, transform_indices = @transform_1, window_bounds = array<i64: 128, 256>}, {pipeline_mode = #tpu.pipeline_mode<synchronous>, transform_indices = @transform_2, window_bounds = array<i64: 256, 8>}, {transform_indices = @transform_3, window_bounds = array<i64: 128, 256>}, {transform_indices = @transform_4, window_bounds = array<i64: 128, 8>}]} {
    %c0 = arith.constant 0 : index
    %c0_0 = arith.constant 0 : index
    %0 = vector.load %arg1[%c0, %c0_0] : memref<128x128xbf16, #tpu.memory_space<vmem>>, vector<128x128xbf16>
    %c0_1 = arith.constant 0 : index
    %c0_2 = arith.constant 0 : index
    %1 = vector.load %arg2[%c0_1, %c0_2] : memref<128x256xbf16, #tpu.memory_space<vmem>>, vector<128x256xbf16>
    %cst = arith.constant dense<0.000000e+00> : vector<128x256xf32>
    %2 = tpu.matmul %0, %1, %cst {dimension_numbers = #tpu.dot_dimension_numbers<[1], [0], [0], [1], [0, 0, 1, 1], [], []>} : vector<128x128xbf16>, vector<128x256xbf16>, vector<128x256xf32> -> vector<128x256xf32>
    %3 = arith.truncf %2 : vector<128x256xf32> to vector<128x256xbf16>
    %c0_3 = arith.constant 0 : index
    %c0_4 = arith.constant 0 : index
    %4 = vector.load %arg4[%c0_3, %c0_4] : memref<128x256xbf16, #tpu.memory_space<vmem>>, vector<128x256xbf16>
    tpu.vector_store %arg4[%c0_3, %c0_4], %3 {strides = array<i32>} : memref<128x256xbf16, #tpu.memory_space<vmem>>, vector<128x256xbf16>,
    %c0_5 = arith.constant 0 : index
    %c0_6 = arith.constant 0 : index
    %5 = vector.load %arg3[%c0_5, %c0_6] : memref<256x8xbf16, #tpu.memory_space<vmem>>, vector<256x8xbf16>
    %cst_7 = arith.constant dense<0.000000e+00> : vector<128x8xf32>
    %6 = tpu.matmul %3, %5, %cst_7 {dimension_numbers = #tpu.dot_dimension_numbers<[1], [0], [0], [1], [0, 0, 1, 1], [], []>} : vector<128x256xbf16>, vector<256x8xbf16>, vector<128x8xf32> -> vector<128x8xf32>
    %c0_8 = arith.constant 0 : index
    %c0_9 = arith.constant 0 : index
    %7 = vector.load %arg5[%c0_8, %c0_9] : memref<128x8xf32, #tpu.memory_space<vmem>>, vector<128x8xf32>
    tpu.vector_store %arg5[%c0_8, %c0_9], %6 {strides = array<i32>} : memref<128x8xf32, #tpu.memory_space<vmem>>, vector<128x8xf32>,
    return
  }
  func.func @transform_0(%arg0: i32) -> (i32, i32) {
    %c0_i32 = arith.constant 0 : i32
    %c0_i32_0 = arith.constant 0 : i32
    return %arg0, %c0_i32 : i32, i32
  }
  func.func @transform_1(%arg0: i32) -> (i32, i32) {
    %c0_i32 = arith.constant 0 : i32
    %c0_i32_0 = arith.constant 0 : i32
    %c0_i32_1 = arith.constant 0 : i32
    return %c0_i32, %c0_i32_0 : i32, i32
  }
  func.func @transform_2(%arg0: i32) -> (i32, i32) {
    %c0_i32 = arith.constant 0 : i32
    %c0_i32_0 = arith.constant 0 : i32
    %c0_i32_1 = arith.constant 0 : i32
    return %c0_i32, %c0_i32_0 : i32, i32
  }
  func.func @transform_3(%arg0: i32) -> (i32, i32) {
    %c0_i32 = arith.constant 0 : i32
    %c0_i32_0 = arith.constant 0 : i32
    return %arg0, %c0_i32 : i32, i32
  }
  func.func @transform_4(%arg0: i32) -> (i32, i32) {
    %c0_i32 = arith.constant 0 : i32
    %c0_i32_0 = arith.constant 0 : i32
    return %arg0, %c0_i32 : i32, i32
  }
}

</mosaic_0001>

<bundles_post_ra>
// kernel: tpu_custom_call.1
= control target key start
LH: loop header
LB: loop body
LE: loop exit
PB: predicated region body
PF: predicated region fallthrough
CT: control target
= control target key end

     0   :  { %10 = vsyncpa [#allocation3], 0  ;;  %s1143_s0 = inlined_call_operand.hbm [shape: bf16[128,128], index: 0, kind: input, shape index: {}]   ;;  %s1144_s1 = inlined_call_operand.vmem [shape: bf16[128,256], index: 1, kind: input, shape index: {}]   ;;  %s1145_s2 = inlined_call_operand.vmem [shape: bf16[256,8], index: 2, kind: input, shape index: {}]   ;;  %s1146_s3 = inlined_call_operand.hbm [shape: bf16[128,256], index: 3, kind: output, shape index: {0}]   ;;  %s1147_s4 = inlined_call_operand.vmem [shape: f32[128,8], index: 4, kind: output, shape index: {1}]  }
   0x1   :  { %11 = vsyncpa [#allocation4], 0  ;;  %s919_s15 = smov [#allocation2]   ;;  %s871_s19 = scalar_lea.hbm %s1143_s0, 1024 }
   0x2   :  { %s17_s16 = sshll.u32 %s919_s15, 4  ;;  %p872_p0 = scmp.ne.s32.totalorder %s1143_s0, %s871_s19  ;;  %s18_s16 = int_to_ptr.vmem [resolvable:$true] %s17_s16 }
   0x3   :  { %p875_p1 = scmp.lt.u32.totalorder %s871_s19, %s1143_s0 }
   0x5   :  { %p877_p2 = pnand %p875_p1, %p872_p0 }
   0x7   :  { %880 = shalt.err (!%p877_p2)
}
   0x8   :  { %s881_s24 = scalar_lea.vmem %s18_s16, 1024  ;;  %p886_p4 = scmp.lt.s32.totalorder %s18_s16, %s18_s16 }
   0x9   :  { %p882_p3 = scmp.ne.s32.totalorder %s18_s16, %s881_s24  ;;  %p887_p5 = scmp.lt.s32.totalorder %s881_s24, %s881_s24 }
   0xb   :  { %p888_p6 = por %p887_p5, %p886_p4 }
   0xd   :  { %p889_p7 = pnand %p888_p6, %p882_p3 }
   0xf   :  { %892 = shalt.err (!%p889_p7)
}
  0x10   :  { %s920_s25 = smov 64   ;;  %s921_s26 = smov 4  }
  0x11   :  { %23 = dma.hbm_to_vmem [thread:$0]  %s1143_s0, 1024, %s18_s16, [#allocation3], %s920_s25, %s920_s25, %s921_s26  }
  0x12   :  { %915 = dma.done.wait [#allocation3], 1024  }
  0x13   :  { %916 = vsyncadd [#allocation3], 4294966272  ;;  %v922_v0 = vmov 0   ;;  %v823_v1 = vld [vmem:[%s1144_s1 + $0x4] ss:$8 sps:$4 sm:$0xff]   ;;  %v859_v19 = vld [vmem:[%s1145_s2 + $0x50] sm:$0xff]  }
  0x14   :  { %224 = vmatprep.mubr.bf16.mxu0 %v922_v0  ;;  %v825_v2 = vld [vmem:[%s1144_s1] ss:$8 sps:$4 sm:$0xff]   ;;  %192 = vmatprep.subr.bf16.mxu0 %v823_v1  ;;  %v826_v3 = vld [vmem:[%s1144_s1 + $0x14] ss:$8 sps:$4 sm:$0xff]   ;;  %v828_v4 = vld [vmem:[%s1144_s1 + $0x10] ss:$8 sps:$4 sm:$0xff]  }
  0x15   :  { %193 = vmatpush1.bf16.msra.mxu0 %v825_v2  ;;  %v829_v5 = vld [vmem:[%s1144_s1 + $0x24] ss:$8 sps:$4 sm:$0xff]   ;;  %v831_v6 = vld [vmem:[%s1144_s1 + $0x20] ss:$8 sps:$4 sm:$0xff]   ;;  %v832_v7 = vld [vmem:[%s1144_s1 + $0x34] ss:$8 sps:$4 sm:$0xff]  }
  0x16   :  { %194 = vmatprep.subr.bf16.mxu0 %v826_v3  ;;  %v834_v8 = vld [vmem:[%s1144_s1 + $0x30] ss:$8 sps:$4 sm:$0xff]   ;;  %v835_v9 = vld [vmem:[%s1144_s1 + $0x44] ss:$8 sps:$4 sm:$0xff]   ;;  %v837_v10 = vld [vmem:[%s1144_s1 + $0x40] ss:$8 sps:$4 sm:$0xff]  }
  0x17   :  { %v838_v11 = vld [vmem:[%s1144_s1 + $0x54] ss:$8 sps:$4 sm:$0xff]   ;;  %v840_v12 = vld [vmem:[%s1144_s1 + $0x50] ss:$8 sps:$4 sm:$0xff]   ;;  %v841_v13 = vld [vmem:[%s1144_s1 + $0x64] ss:$8 sps:$4 sm:$0xff]  }
  0x18   :  { %v855_v14 = vld [vmem:[%s1145_s2 + $0x40] sm:$0xff]   ;;  %v857_v17 = vld [vmem:[%s1145_s2 + $0x48] sm:$0xff]   ;;  %v844_v20 = vld [vmem:[%s1144_s1 + $0x74] ss:$8 sps:$4 sm:$0xff]  }
  0x19   :  { %195 = vmatpush1.bf16.msra.mxu0 %v828_v4  ;;  %v856_v15 = vld [vmem:[%s1145_s2] sm:$0xff]   ;;  %752 = vmatprep.subr.bf16.mxu1 %v855_v14  ;;  %v858_v18 = vld [vmem:[%s1145_s2 + $0x8] sm:$0xff]   ;;  %v846_v21 = vld [vmem:[%s1144_s1 + $0x70] ss:$8 sps:$4 sm:$0xff]  }
  0x1a   :  { %196 = vmatprep.subr.bf16.mxu0 %v829_v5  ;;  %v843_v16 = vld [vmem:[%s1144_s1 + $0x60] ss:$8 sps:$4 sm:$0xff]   ;;  %753 = vmatpush3.bf16.msra.mxu1 %v856_v15  ;;  %v860_v22 = vld [vmem:[%s1145_s2 + $0x10] sm:$0xff]   ;;  %v861_v23 = vld [vmem:[%s1145_s2 + $0x58] sm:$0xff]  }
  0x1b   :  { %754 = vmatprep.subr.bf16.mxu1 %v857_v17  ;;  %v847_v24 = vld [vmem:[#allocation2] sm:$0xff]   ;;  %v862_v25 = vld [vmem:[%s1145_s2 + $0x18] sm:$0xff]   ;;  %v865_v28 = vld [vmem:[%s1145_s2 + $0x68] sm:$0xff]  }
  0x1c   :  { %v863_v26 = vld [vmem:[%s1145_s2 + $0x60] sm:$0xff]   ;;  %v848_v29 = vld [vmem:[#allocation2 + $0x8] sm:$0xff]   ;;  %v867_v31 = vld [vmem:[%s1145_s2 + $0x70] sm:$0xff]  }
  0x1d   :  { %197 = vmatpush1.bf16.msra.mxu0 %v831_v6  ;;  %v864_v27 = vld [vmem:[%s1145_s2 + $0x20] sm:$0xff]   ;;  %v866_v30 = vld [vmem:[%s1145_s2 + $0x28] sm:$0xff]   ;;  %v849_v32 = vld [vmem:[#allocation2 + $0x10] sm:$0xff]  }
  0x1e   :  { %198 = vmatprep.subr.bf16.mxu0 %v832_v7  ;;  %755 = vmatpush3.bf16.msra.mxu1 %v858_v18  ;;  %v850_v33 = vld [vmem:[#allocation2 + $0x18] sm:$0xff]   ;;  %v851_v34 = vld [vmem:[#allocation2 + $0x20] sm:$0xff]   ;;  %v852_v35 = vld [vmem:[#allocation2 + $0x28] sm:$0xff]  }
  0x1f   :  { %756 = vmatprep.subr.bf16.mxu1 %v859_v19  ;;  %v853_v36 = vld [vmem:[#allocation2 + $0x30] sm:$0xff]   ;;  %v854_v37 = vld [vmem:[#allocation2 + $0x38] sm:$0xff]  }
  0x20   :  { %v868_v38 = vld [vmem:[%s1145_s2 + $0x30] sm:$0xff]   ;;  %v869_v39 = vld [vmem:[%s1145_s2 + $0x78] sm:$0xff]  }
  0x21   :  { %199 = vmatpush1.bf16.msra.mxu0 %v834_v8  ;;  %v870_v40 = vld [vmem:[%s1145_s2 + $0x38] sm:$0xff]   ;;  %s923_s2 = smov [#allocation5]  }
  0x22   :  { %200 = vmatprep.subr.bf16.mxu0 %v835_v9  ;;  %757 = vmatpush3.bf16.msra.mxu1 %v860_v22  ;;  %s664_s11 = sshll.u32 %s923_s2, 4  ;;  %s665_s11 = int_to_ptr.vmem [resolvable:$true] %s664_s11 }
  0x23   :  { %758 = vmatprep.subr.bf16.mxu1 %v861_v23  ;;  %s893_s12 = scalar_lea.vmem %s665_s11, 2048  ;;  %p898_p9 = scmp.lt.s32.totalorder %s665_s11, %s665_s11 }
  0x24   :  { %p894_p8 = scmp.ne.s32.totalorder %s665_s11, %s893_s12  ;;  %p899_p10 = scmp.lt.s32.totalorder %s893_s12, %s893_s12 }
  0x25   :  { %201 = vmatpush1.bf16.msra.mxu0 %v837_v10 }
  0x26   :  { %202 = vmatprep.subr.bf16.mxu0 %v838_v11  ;;  %759 = vmatpush3.bf16.msra.mxu1 %v862_v25  ;;  %p900_p11 = por %p899_p10, %p898_p9 }
  0x27   :  { %760 = vmatprep.subr.bf16.mxu1 %v863_v26 }
  0x28   :  { %p901_p12 = pnand %p900_p11, %p894_p8 }
  0x29   :  { %203 = vmatpush1.bf16.msra.mxu0 %v840_v12 }
  0x2a   :  { %204 = vmatprep.subr.bf16.mxu0 %v841_v13  ;;  %761 = vmatpush3.bf16.msra.mxu1 %v864_v27 }
  0x2b   :  { %762 = vmatprep.subr.bf16.mxu1 %v865_v28 }
  0x2d   :  { %205 = vmatpush1.bf16.msra.mxu0 %v843_v16 }
  0x2e   :  { %206 = vmatprep.subr.bf16.mxu0 %v844_v20  ;;  %763 = vmatpush3.bf16.msra.mxu1 %v866_v30 }
  0x2f   :  { %764 = vmatprep.subr.bf16.mxu1 %v867_v31 }
  0x31   :  { %207 = vmatpush1.bf16.msra.mxu0 %v846_v21 }
  0x32   :  { %765 = vmatpush3.bf16.msra.mxu1 %v868_v38 }
  0x33   :  { %766 = vmatprep.subr.bf16.mxu1 %v869_v39 }
  0x34   :  { %225 = vmatmul.mubr.bf16.vlgmr.msra.gmra.mrb[0].mxu0 %v847_v24 }
  0x35   :  { %234 = vmatprep.mubr.bf16.mxu0 %v922_v0 }
  0x36   :  { %767 = vmatpush3.bf16.msra.mxu1 %v870_v40 }
  0x3c   :  { %235 = vmatmul.mubr.bf16.gmra.mrb[4].mxu0 %v848_v29 }
  0x3d   :  { %244 = vmatprep.mubr.bf16.mxu0 %v922_v0 }
  0x44   :  { %245 = vmatmul.mubr.bf16.gmra.mrb[8].mxu0 %v849_v32 }
  0x45   :  { %254 = vmatprep.mubr.bf16.mxu0 %v922_v0 }
  0x4c   :  { %255 = vmatmul.mubr.bf16.gmra.mrb[12].mxu0 %v850_v33 }
  0x4d   :  { %264 = vmatprep.mubr.bf16.mxu0 %v922_v0 }
  0x54   :  { %265 = vmatmul.mubr.bf16.gmra.mrb[16].mxu0 %v851_v34 }
  0x55   :  { %274 = vmatprep.mubr.bf16.mxu0 %v922_v0 }
  0x5c   :  { %275 = vmatmul.mubr.bf16.gmra.mrb[20].mxu0 %v852_v35 }
  0x5d   :  { %284 = vmatprep.mubr.bf16.mxu0 %v922_v0 }
  0x64   :  { %285 = vmatmul.mubr.bf16.gmra.mrb[24].mxu0 %v853_v36 }
  0x65   :  { %294 = vmatprep.mubr.bf16.mxu0 %v922_v0 }
  0x6c   :  { %295 = vmatmul.mubr.bf16.gmra.mrb[28].mxu0 %v854_v37 }
 0x107   :  { %v226_v41 = vpop.f32.mrb[0].mxu0 }
 0x108   :  { %v228_v42 = vpop.f32.mrb[1].mxu0 }
 0x109   :  { %v736_v43 = vpack.c.bf16 %v228_v42, %v226_v41  ;;  %v230_v44 = vpop.f32.mrb[2].mxu0 }
 0x10a   :  { %v305_v45 = vpack.c.bf16 %v230_v44, %v226_v41  ;;  %v232_v46 = vpop.f32.mrb[3].mxu0 }
 0x10b   :  { %401 = vst [vmem:[#allocation5] sm:$0xff] %v736_v43  ;;  %v737_v47 = vpack.c.bf16 %v232_v46, %v230_v44  ;;  %v306_v48 = vpack.c.bf16 %v232_v46, %v228_v42 }
 0x10d   :  { %402 = vst [vmem:[#allocation5 + $0x8] sm:$0xff] %v737_v47  ;;  %577 = vmatprep.mubr.bf16.mxu1 %v306_v48 }
 0x10e   :  { %578 = vmatmul.mubr.bf16.vlgmr.msra.gmra.mrb[0].mxu1 %v305_v45 }
 0x10f   :  { %v236_v49 = vpop.f32.mrb[4].mxu0 }
 0x110   :  { %v238_v50 = vpop.f32.mrb[5].mxu0 }
 0x111   :  { %v738_v51 = vpack.c.bf16 %v238_v50, %v236_v49  ;;  %v240_v52 = vpop.f32.mrb[6].mxu0 }
 0x112   :  { %v307_v53 = vpack.c.bf16 %v240_v52, %v236_v49  ;;  %v242_v54 = vpop.f32.mrb[7].mxu0 }
 0x113   :  { %403 = vst [vmem:[#allocation5 + $0x10] sm:$0xff] %v738_v51  ;;  %v308_v55 = vpack.c.bf16 %v242_v54, %v238_v50  ;;  %v739_v56 = vpack.c.bf16 %v242_v54, %v240_v52 }
 0x115   :  { %404 = vst [vmem:[#allocation5 + $0x18] sm:$0xff] %v739_v56  ;;  %585 = vmatprep.mubr.bf16.mxu1 %v308_v55 }
 0x116   :  { %586 = vmatmul.mubr.bf16.gmra.mrb[4].mxu1 %v307_v53 }
 0x117   :  { %v246_v57 = vpop.f32.mrb[8].mxu0 }
 0x118   :  { %v248_v58 = vpop.f32.mrb[9].mxu0 }
 0x119   :  { %v740_v59 = vpack.c.bf16 %v248_v58, %v246_v57  ;;  %v250_v60 = vpop.f32.mrb[10].mxu0 }
 0x11a   :  { %v309_v61 = vpack.c.bf16 %v250_v60, %v246_v57  ;;  %v252_v62 = vpop.f32.mrb[11].mxu0 }
 0x11b   :  { %405 = vst [vmem:[#allocation5 + $0x20] sm:$0xff] %v740_v59  ;;  %v310_v63 = vpack.c.bf16 %v252_v62, %v248_v58  ;;  %v741_v0 = vpack.c.bf16 %v252_v62, %v250_v60 }
 0x11d   :  { %406 = vst [vmem:[#allocation5 + $0x28] sm:$0xff] %v741_v0  ;;  %593 = vmatprep.mubr.bf16.mxu1 %v310_v63 }
 0x11e   :  { %594 = vmatmul.mubr.bf16.gmra.mrb[8].mxu1 %v309_v61 }
 0x11f   :  { %v256_v1 = vpop.f32.mrb[12].mxu0 }
 0x120   :  { %v258_v2 = vpop.f32.mrb[13].mxu0 }
 0x121   :  { %v742_v3 = vpack.c.bf16 %v258_v2, %v256_v1  ;;  %v260_v4 = vpop.f32.mrb[14].mxu0 }
 0x122   :  { %v311_v5 = vpack.c.bf16 %v260_v4, %v256_v1  ;;  %v262_v6 = vpop.f32.mrb[15].mxu0 }
 0x123   :  { %407 = vst [vmem:[#allocation5 + $0x30] sm:$0xff] %v742_v3  ;;  %v312_v7 = vpack.c.bf16 %v262_v6, %v258_v2  ;;  %v743_v8 = vpack.c.bf16 %v262_v6, %v260_v4 }
 0x125   :  { %408 = vst [vmem:[#allocation5 + $0x38] sm:$0xff] %v743_v8  ;;  %601 = vmatprep.mubr.bf16.mxu1 %v312_v7 }
 0x126   :  { %602 = vmatmul.mubr.bf16.gmra.mrb[12].mxu1 %v311_v5 }
 0x127   :  { %v266_v9 = vpop.f32.mrb[16].mxu0 }
 0x128   :  { %v268_v10 = vpop.f32.mrb[17].mxu0 }
 0x129   :  { %v744_v11 = vpack.c.bf16 %v268_v10, %v266_v9  ;;  %v270_v12 = vpop.f32.mrb[18].mxu0 }
 0x12a   :  { %v313_v13 = vpack.c.bf16 %v270_v12, %v266_v9  ;;  %v272_v14 = vpop.f32.mrb[19].mxu0 }
 0x12b   :  { %409 = vst [vmem:[#allocation5 + $0x40] sm:$0xff] %v744_v11  ;;  %v314_v15 = vpack.c.bf16 %v272_v14, %v268_v10  ;;  %v745_v16 = vpack.c.bf16 %v272_v14, %v270_v12 }
 0x12d   :  { %410 = vst [vmem:[#allocation5 + $0x48] sm:$0xff] %v745_v16  ;;  %609 = vmatprep.mubr.bf16.mxu1 %v314_v15 }
 0x12e   :  { %610 = vmatmul.mubr.bf16.gmra.mrb[16].mxu1 %v313_v13 }
 0x12f   :  { %v276_v17 = vpop.f32.mrb[20].mxu0 }
 0x130   :  { %v278_v18 = vpop.f32.mrb[21].mxu0 }
 0x131   :  { %v746_v19 = vpack.c.bf16 %v278_v18, %v276_v17  ;;  %v280_v20 = vpop.f32.mrb[22].mxu0 }
 0x132   :  { %v315_v21 = vpack.c.bf16 %v280_v20, %v276_v17  ;;  %v282_v22 = vpop.f32.mrb[23].mxu0 }
 0x133   :  { %411 = vst [vmem:[#allocation5 + $0x50] sm:$0xff] %v746_v19  ;;  %v316_v23 = vpack.c.bf16 %v282_v22, %v278_v18  ;;  %v747_v24 = vpack.c.bf16 %v282_v22, %v280_v20 }
 0x135   :  { %412 = vst [vmem:[#allocation5 + $0x58] sm:$0xff] %v747_v24  ;;  %617 = vmatprep.mubr.bf16.mxu1 %v316_v23 }
 0x136   :  { %618 = vmatmul.mubr.bf16.gmra.mrb[20].mxu1 %v315_v21 }
 0x137   :  { %v286_v25 = vpop.f32.mrb[24].mxu0 }
 0x138   :  { %v288_v26 = vpop.f32.mrb[25].mxu0 }
 0x139   :  { %v748_v27 = vpack.c.bf16 %v288_v26, %v286_v25  ;;  %v290_v28 = vpop.f32.mrb[26].mxu0 }
 0x13a   :  { %v317_v29 = vpack.c.bf16 %v290_v28, %v286_v25  ;;  %v292_v30 = vpop.f32.mrb[27].mxu0 }
 0x13b   :  { %413 = vst [vmem:[#allocation5 + $0x60] sm:$0xff] %v748_v27  ;;  %v318_v31 = vpack.c.bf16 %v292_v30, %v288_v26  ;;  %v749_v32 = vpack.c.bf16 %v292_v30, %v290_v28 }
 0x13d   :  { %414 = vst [vmem:[#allocation5 + $0x68] sm:$0xff] %v749_v32  ;;  %625 = vmatprep.mubr.bf16.mxu1 %v318_v31 }
 0x13e   :  { %626 = vmatmul.mubr.bf16.gmra.mrb[24].mxu1 %v317_v29 }
 0x13f   :  { %v296_v33 = vpop.f32.mrb[28].mxu0 }
 0x140   :  { %v298_v34 = vpop.f32.mrb[29].mxu0 }
 0x141   :  { %v750_v35 = vpack.c.bf16 %v298_v34, %v296_v33  ;;  %v300_v36 = vpop.f32.mrb[30].mxu0 }
 0x142   :  { %v319_v37 = vpack.c.bf16 %v300_v36, %v296_v33  ;;  %v302_v38 = vpop.f32.mrb[31].mxu0 }
 0x143   :  { %415 = vst [vmem:[#allocation5 + $0x70] sm:$0xff] %v750_v35  ;;  %v320_v39 = vpack.c.bf16 %v302_v38, %v298_v34  ;;  %v751_v40 = vpack.c.bf16 %v302_v38, %v300_v36 }
 0x145   :  { %416 = vst [vmem:[#allocation5 + $0x78] sm:$0xff] %v751_v40  ;;  %633 = vmatprep.mubr.bf16.mxu1 %v320_v39 }
 0x146   :  { %634 = vmatmul.mubr.bf16.gmra.mrb[28].mxu1 %v319_v37 }
 0x147   :  { %904 = shalt.err (!%p901_p12)
}
 0x148   :  { %s905_s15 = scalar_lea.hbm %s1146_s3, 2048 }
 0x149   :  { %p906_p13 = scmp.ne.s32.totalorder %s1146_s3, %s905_s15  ;;  %p909_p0 = scmp.lt.u32.totalorder %s905_s15, %s1146_s3 }
 0x14b   :  { %p911_p1 = pnand %p909_p0, %p906_p13 }
 0x14d   :  { %914 = shalt.err (!%p911_p1)
}
 0x14e   :  { %s924_s20 = smov 128   ;;  %s925_s21 = smov 8   ;;  %vm642_vm0 = vcmask 64512  }
 0x14f   :  { %670 = dma.vmem_to_hbm [thread:$0]  %s665_s11, 2048, %s1146_s3, [#allocation4], %s924_s20, %s924_s20, %s925_s21  }
 0x1e1   :  { %v768_v41 = vpop.f32.mrb[0].mxu1 }
 0x1e2   :  { %v769_v42 = vpop.f32.mrb[1].mxu1 }
 0x1e3   :  { %v770_v43 = vadd.f32 %v769_v42, %v768_v41  ;;  %v771_v44 = vpop.f32.mrb[2].mxu1 }
 0x1e4   :  { %v772_v45 = vpop.f32.mrb[3].mxu1 }
 0x1e5   :  { %643 = vst.msk [vmem:[%s1147_s4] sm:$0xff] %vm642_vm0, %v770_v43  ;;  %v773_v46 = vadd.f32 %v772_v45, %v771_v44 }
 0x1e7   :  { %644 = vst.msk [vmem:[%s1147_s4 + $0x8] sm:$0xff] %vm642_vm0, %v773_v46 }
 0x1e9   :  { %v774_v47 = vpop.f32.mrb[4].mxu1 }
 0x1ea   :  { %v775_v48 = vpop.f32.mrb[5].mxu1 }
 0x1eb   :  { %v776_v49 = vadd.f32 %v775_v48, %v774_v47  ;;  %v777_v50 = vpop.f32.mrb[6].mxu1 }
 0x1ec   :  { %v778_v51 = vpop.f32.mrb[7].mxu1 }
 0x1ed   :  { %645 = vst.msk [vmem:[%s1147_s4 + $0x10] sm:$0xff] %vm642_vm0, %v776_v49  ;;  %v779_v52 = vadd.f32 %v778_v51, %v777_v50 }
 0x1ef   :  { %646 = vst.msk [vmem:[%s1147_s4 + $0x18] sm:$0xff] %vm642_vm0, %v779_v52 }
 0x1f1   :  { %v780_v53 = vpop.f32.mrb[8].mxu1 }
 0x1f2   :  { %v781_v54 = vpop.f32.mrb[9].mxu1 }
 0x1f3   :  { %v782_v55 = vadd.f32 %v781_v54, %v780_v53  ;;  %v783_v56 = vpop.f32.mrb[10].mxu1 }
 0x1f4   :  { %v784_v57 = vpop.f32.mrb[11].mxu1 }
 0x1f5   :  { %647 = vst.msk [vmem:[%s1147_s4 + $0x20] sm:$0xff] %vm642_vm0, %v782_v55  ;;  %v785_v58 = vadd.f32 %v784_v57, %v783_v56 }
 0x1f7   :  { %648 = vst.msk [vmem:[%s1147_s4 + $0x28] sm:$0xff] %vm642_vm0, %v785_v58 }
 0x1f9   :  { %v786_v59 = vpop.f32.mrb[12].mxu1 }
 0x1fa   :  { %v787_v60 = vpop.f32.mrb[13].mxu1 }
 0x1fb   :  { %v788_v61 = vadd.f32 %v787_v60, %v786_v59  ;;  %v789_v62 = vpop.f32.mrb[14].mxu1 }
 0x1fc   :  { %v790_v63 = vpop.f32.mrb[15].mxu1 }
 0x1fd   :  { %649 = vst.msk [vmem:[%s1147_s4 + $0x30] sm:$0xff] %vm642_vm0, %v788_v61  ;;  %v791_v0 = vadd.f32 %v790_v63, %v789_v62 }
 0x1ff   :  { %650 = vst.msk [vmem:[%s1147_s4 + $0x38] sm:$0xff] %vm642_vm0, %v791_v0 }
 0x201   :  { %v792_v1 = vpop.f32.mrb[16].mxu1 }
 0x202   :  { %v793_v2 = vpop.f32.mrb[17].mxu1 }
 0x203   :  { %v794_v3 = vadd.f32 %v793_v2, %v792_v1  ;;  %v795_v4 = vpop.f32.mrb[18].mxu1 }
 0x204   :  { %v796_v5 = vpop.f32.mrb[19].mxu1 }
 0x205   :  { %651 = vst.msk [vmem:[%s1147_s4 + $0x40] sm:$0xff] %vm642_vm0, %v794_v3  ;;  %v797_v6 = vadd.f32 %v796_v5, %v795_v4 }
 0x207   :  { %652 = vst.msk [vmem:[%s1147_s4 + $0x48] sm:$0xff] %vm642_vm0, %v797_v6 }
 0x209   :  { %v798_v7 = vpop.f32.mrb[20].mxu1 }
 0x20a   :  { %v799_v8 = vpop.f32.mrb[21].mxu1 }
 0x20b   :  { %v800_v9 = vadd.f32 %v799_v8, %v798_v7  ;;  %v801_v10 = vpop.f32.mrb[22].mxu1 }
 0x20c   :  { %v802_v11 = vpop.f32.mrb[23].mxu1 }
 0x20d   :  { %653 = vst.msk [vmem:[%s1147_s4 + $0x50] sm:$0xff] %vm642_vm0, %v800_v9  ;;  %v803_v12 = vadd.f32 %v802_v11, %v801_v10 }
 0x20f   :  { %654 = vst.msk [vmem:[%s1147_s4 + $0x58] sm:$0xff] %vm642_vm0, %v803_v12 }
 0x211   :  { %v804_v13 = vpop.f32.mrb[24].mxu1 }
 0x212   :  { %v805_v14 = vpop.f32.mrb[25].mxu1 }
 0x213   :  { %v806_v15 = vadd.f32 %v805_v14, %v804_v13  ;;  %v807_v16 = vpop.f32.mrb[26].mxu1 }
 0x214   :  { %v808_v17 = vpop.f32.mrb[27].mxu1 }
 0x215   :  { %655 = vst.msk [vmem:[%s1147_s4 + $0x60] sm:$0xff] %vm642_vm0, %v806_v15  ;;  %v809_v18 = vadd.f32 %v808_v17, %v807_v16 }
 0x217   :  { %656 = vst.msk [vmem:[%s1147_s4 + $0x68] sm:$0xff] %vm642_vm0, %v809_v18 }
 0x219   :  { %v810_v19 = vpop.f32.mrb[28].mxu1 }
 0x21a   :  { %v811_v20 = vpop.f32.mrb[29].mxu1 }
 0x21b   :  { %v812_v21 = vadd.f32 %v811_v20, %v810_v19  ;;  %v813_v22 = vpop.f32.mrb[30].mxu1 }
 0x21c   :  { %v814_v23 = vpop.f32.mrb[31].mxu1 }
 0x21d   :  { %657 = vst.msk [vmem:[%s1147_s4 + $0x70] sm:$0xff] %vm642_vm0, %v812_v21  ;;  %v815_v24 = vadd.f32 %v814_v23, %v813_v22 }
 0x21f   :  { %658 = vst.msk [vmem:[%s1147_s4 + $0x78] sm:$0xff] %vm642_vm0, %v815_v24 }
 0x220   :  { %917 = dma.done.wait [#allocation4], 2048  }
 0x221   :  { %918 = vsyncadd [#allocation4], 4294965248 }
 0x222   :  { %678 = vsyncpa [#allocation3], 1 }
 0x223   :  { %679 = vsyncpa [#allocation4], 1 }

</bundles_post_ra>
